<compile_context>
chip_gen: v7x
topology: tpu7x:2x2x1
jax: 0.10.0
libtpu: 0.0.40
codegen_flags: <defaults>
</compile_context>

<pallas_src>
import functools

import jax
import jax.numpy as jnp
from jax.experimental import pallas as pl
from jax.experimental.pallas import tpu as pltpu


def _round_up(x, m):
    return (x + m - 1) // m * m


def attention_kernel(bias_ref, lk_ref, w_ref, q_ref, k_ref, v_ref,
                     weights_ref, out_ref, *, mask_keys):
    # bias_ref: (1,) f32 in SMEM, lk_ref: (1,) i32 in SMEM (true #keys)
    # w_ref: (dP, dP); q_ref: (TQ, dP); k_ref: (LkP, dP); v_ref: (LkP, dvP)
    q = q_ref[...]
    k = k_ref[...]
    v = v_ref[...]

    # (query @ W) on the MXU, fp32 accumulation, operands kept in input dtype.
    qw = jnp.dot(q, w_ref[...], preferred_element_type=jnp.float32)
    qw = qw.astype(k.dtype)

    # scores = qW @ K^T without materializing a transpose: contract on d.
    scores = jax.lax.dot_general(
        qw, k,
        dimension_numbers=(((1,), (1,)), ((), ())),
        preferred_element_type=jnp.float32,
    )
    scores = scores + bias_ref[0]

    if mask_keys:
        # Padded key columns must not receive probability mass.
        col = jax.lax.broadcasted_iota(jnp.int32, scores.shape, 1)
        scores = jnp.where(col < lk_ref[0], scores,
                           jnp.finfo(jnp.float32).min)

    # Numerically-stable softmax over the key axis.
    m = jnp.max(scores, axis=-1, keepdims=True)
    e = jnp.exp(scores - m)
    denom = jnp.sum(e, axis=-1, keepdims=True)
    inv = pl.reciprocal(denom, approx=True)
    inv = inv * (2.0 - denom * inv)          # one Newton step -> ~f32 accuracy
    probs = e * inv                          # (TQ, LkP)

    weights_ref[...] = probs.astype(weights_ref.dtype)
    out_ref[...] = jnp.dot(
        probs.astype(v.dtype), v, preferred_element_type=jnp.float32
    ).astype(out_ref.dtype)


def _vmem_estimate(tq, lk_p, d_p, dv_p, itemsize):
    # double-buffered I/O tiles + fp32 intermediates (qW, scores, exp, probs)
    tiles = (tq * d_p + lk_p * d_p + lk_p * dv_p + d_p * d_p
             + tq * lk_p + tq * dv_p)
    interm = 3 * tq * lk_p + tq * d_p
    return 2 * tiles * itemsize + interm * 4


def attention(key, query, value, W, bias, *, tq_max=512):
    B, Lq, d = query.shape
    _, Lk, _ = key.shape
    dv = value.shape[-1]
    itemsize = jnp.dtype(query.dtype).itemsize

    # Lane-dense padding (exactness preserved: zero feature columns add
    # nothing to the dot products, padded keys are masked in-kernel, padded
    # query rows / value columns are sliced off afterwards).
    d_p = _round_up(d, 128)
    dv_p = _round_up(dv, 128)
    lk_p = _round_up(Lk, 128)

    # Query-tile size: multiple of 8 sublanes, shrunk until the per-step
    # working set fits comfortably in VMEM on every TPU generation.
    TQ = min(tq_max, _round_up(Lq, 8))
    while TQ > 8 and _vmem_estimate(TQ, lk_p, d_p, dv_p, itemsize) > 44 * 1024 * 1024:
        TQ = max(8, _round_up(TQ // 2, 8))
    lq_p = _round_up(Lq, TQ)
    num_q_tiles = lq_p // TQ

    qp = jnp.pad(query, ((0, 0), (0, lq_p - Lq), (0, d_p - d)))
    kp = jnp.pad(key, ((0, 0), (0, lk_p - Lk), (0, d_p - d)))
    vp = jnp.pad(value, ((0, 0), (0, lk_p - Lk), (0, dv_p - dv)))
    Wp = jnp.pad(W, ((0, d_p - d), (0, d_p - d)))
    lk_scalar = jnp.array([Lk], dtype=jnp.int32)

    est = _vmem_estimate(TQ, lk_p, d_p, dv_p, itemsize)
    vmem_limit = None
    if est > 24 * 1024 * 1024:
        # Raise the scoped-VMEM limit only when the tiles actually need it
        # (keeps us inside v7x's 64 MiB physical VMEM).
        vmem_limit = min(60 * 1024 * 1024, max(40 * 1024 * 1024, int(est * 1.3)))

    kernel = functools.partial(attention_kernel, mask_keys=(lk_p != Lk))

    weights_p, out_p = pl.pallas_call(
        kernel,
        out_shape=(
            jax.ShapeDtypeStruct((B, lq_p, lk_p), query.dtype),   # attn weights
            jax.ShapeDtypeStruct((B, lq_p, dv_p), query.dtype),   # weighted values
        ),
        grid=(B, num_q_tiles),
        in_specs=[
            pl.BlockSpec(memory_space=pltpu.MemorySpace.SMEM),            # bias (1,)
            pl.BlockSpec(memory_space=pltpu.MemorySpace.SMEM),            # true Lk (1,)
            pl.BlockSpec((d_p, d_p), lambda b, i: (0, 0)),                # W
            pl.BlockSpec((None, TQ, d_p), lambda b, i: (b, i, 0)),        # query tile
            pl.BlockSpec((None, lk_p, d_p), lambda b, i: (b, 0, 0)),      # key
            pl.BlockSpec((None, lk_p, dv_p), lambda b, i: (b, 0, 0)),     # value
        ],
        out_specs=(
            pl.BlockSpec((None, TQ, lk_p), lambda b, i: (b, i, 0)),
            pl.BlockSpec((None, TQ, dv_p), lambda b, i: (b, i, 0)),
        ),
        compiler_params=pltpu.CompilerParams(
            dimension_semantics=("parallel", "parallel"),
            vmem_limit_bytes=vmem_limit,
        ),
    )(bias, lk_scalar, Wp, qp, kp, vp)

    # Strip padding.
    weights = weights_p[:, :Lq, :Lk]
    out = out_p[:, :Lq, :dv]
    return weights, out


if __name__ == "__main__":
    # Small shapes consistent with the module's forward.
    B, Lq, Lk, d_model, dv = 2, 8, 8, 32, 32

    rng = jax.random.PRNGKey(0)
    k_w, k_b, k_q, k_k, k_v = jax.random.split(rng, 5)

    W = jax.random.normal(k_w, (d_model, d_model), jnp.float32)
    bias = jax.random.normal(k_b, (1,), jnp.float32)

    query = jax.random.normal(k_q, (B, Lq, d_model), jnp.float32)
    key = jax.random.normal(k_k, (B, Lk, d_model), jnp.float32)
    value = jax.random.normal(k_v, (B, Lk, dv), jnp.float32)

    weights, out = attention(key, query, value, W, bias)
    jax.block_until_ready((weights, out))

    # Pure-JAX reference check (mirrors the PyTorch forward).
    ref_scores = jnp.einsum("bqd,de,bke->bqk", query, W, key) + bias[0]
    ref_weights = jax.nn.softmax(ref_scores, axis=-1)
    ref_out = jnp.einsum("bqk,bkv->bqv", ref_weights, value)
    assert jnp.allclose(weights, ref_weights, atol=1e-4, rtol=1e-4)
    assert jnp.allclose(out, ref_out, atol=1e-4, rtol=1e-4)

    # TODO(synk): dropout (dropout_rate != 0) not implemented; module default is 0.
    print("KERNEL_OK")
</pallas_src>

<mosaic_0001>
module attributes {stable_mosaic.version = 11 : i64} {
  func.func @attention_kernel(%arg0: i32, %arg1: i32, %arg2: memref<1xf32, #tpu.memory_space<smem>>, %arg3: memref<1xi32, #tpu.memory_space<smem>>, %arg4: memref<128x128xf32, #tpu.memory_space<vmem>>, %arg5: memref<1x8x128xf32, #tpu.memory_space<vmem>>, %arg6: memref<1x128x128xf32, #tpu.memory_space<vmem>>, %arg7: memref<1x128x128xf32, #tpu.memory_space<vmem>>, %arg8: memref<1x8x128xf32, #tpu.memory_space<vmem>>, %arg9: memref<1x8x128xf32, #tpu.memory_space<vmem>>) attributes {dimension_semantics = [#tpu.dimension_semantics<parallel>, #tpu.dimension_semantics<parallel>], iteration_bounds = array<i64: 2, 1>, scalar_prefetch = 0 : i64, scratch_operands = 0 : i64, tpu.core_type = #tpu.core_type<tc>, window_params = [{transform_indices = @transform_0, window_bounds = array<i64: 1>}, {transform_indices = @transform_1, window_bounds = array<i64: 1>}, {pipeline_mode = #tpu.pipeline_mode<synchronous>, transform_indices = @transform_2, window_bounds = array<i64: 128, 128>}, {transform_indices = @transform_3, window_bounds = array<i64: 1, 8, 128>}, {transform_indices = @transform_4, window_bounds = array<i64: 1, 128, 128>}, {transform_indices = @transform_5, window_bounds = array<i64: 1, 128, 128>}, {transform_indices = @transform_6, window_bounds = array<i64: 1, 8, 128>}, {transform_indices = @transform_7, window_bounds = array<i64: 1, 8, 128>}]} {
    %c0 = arith.constant 0 : index
    %c0_0 = arith.constant 0 : index
    %c0_1 = arith.constant 0 : index
    %0 = vector.load %arg5[%c0, %c0_0, %c0_1] : memref<1x8x128xf32, #tpu.memory_space<vmem>>, vector<1x8x128xf32>
    %1 = vector.shape_cast %0 : vector<1x8x128xf32> to vector<8x128xf32>
    %c0_2 = arith.constant 0 : index
    %c0_3 = arith.constant 0 : index
    %c0_4 = arith.constant 0 : index
    %2 = vector.load %arg6[%c0_2, %c0_3, %c0_4] : memref<1x128x128xf32, #tpu.memory_space<vmem>>, vector<1x128x128xf32>
    %3 = vector.shape_cast %2 : vector<1x128x128xf32> to vector<128x128xf32>
    %c0_5 = arith.constant 0 : index
    %c0_6 = arith.constant 0 : index
    %c0_7 = arith.constant 0 : index
    %4 = vector.load %arg7[%c0_5, %c0_6, %c0_7] : memref<1x128x128xf32, #tpu.memory_space<vmem>>, vector<1x128x128xf32>
    %5 = vector.shape_cast %4 : vector<1x128x128xf32> to vector<128x128xf32>
    %c0_8 = arith.constant 0 : index
    %c0_9 = arith.constant 0 : index
    %6 = vector.load %arg4[%c0_8, %c0_9] : memref<128x128xf32, #tpu.memory_space<vmem>>, vector<128x128xf32>
    %cst = arith.constant dense<0.000000e+00> : vector<8x128xf32>
    %7 = tpu.matmul %1, %6, %cst {dimension_numbers = #tpu.dot_dimension_numbers<[1], [0], [0], [1], [0, 0, 1, 1], [], []>} : vector<8x128xf32>, vector<128x128xf32>, vector<8x128xf32> -> vector<8x128xf32>
    %cst_10 = arith.constant dense<0.000000e+00> : vector<8x128xf32>
    %8 = tpu.matmul %7, %3, %cst_10 {dimension_numbers = #tpu.dot_dimension_numbers<[1], [1], [0], [0], [0, 0, 1, 0], [], []>} : vector<8x128xf32>, vector<128x128xf32>, vector<8x128xf32> -> vector<8x128xf32>
    %c0_11 = arith.constant 0 : index
    %9 = memref.load %arg2[%c0_11] : memref<1xf32, #tpu.memory_space<smem>>
    %10 = vector.broadcast %9 : f32 to vector<8x128xf32>
    %11 = arith.addf %8, %10 : vector<8x128xf32>
    %12 = tpu.iota {dimensions = array<i32: 1>} : vector<8x128xi32>
    %c0_12 = arith.constant 0 : index
    %13 = memref.load %arg3[%c0_12] : memref<1xi32, #tpu.memory_space<smem>>
    %14 = vector.broadcast %13 : i32 to vector<8x128xi32>
    %15 = arith.cmpi slt, %12, %14 : vector<8x128xi32>
    %cst_13 = arith.constant -3.40282347E+38 : f32
    %16 = vector.broadcast %cst_13 : f32 to vector<8x128xf32>
    %17 = arith.select %15, %11, %16 : vector<8x128xi1>, vector<8x128xf32>
    %cst_14 = arith.constant dense<0xFF800000> : vector<8xf32>
    %18 = vector.multi_reduction <maximumf>, %17, %cst_14 [1] : vector<8x128xf32> to vector<8xf32>
    %19 = vector.shape_cast %18 : vector<8xf32> to vector<8x1xf32>
    %20 = vector.broadcast %19 : vector<8x1xf32> to vector<8x128xf32>
    %21 = arith.subf %17, %20 : vector<8x128xf32>
    %22 = math.exp %21 : vector<8x128xf32>
    %cst_15 = arith.constant dense<0.000000e+00> : vector<8xf32>
    %23 = vector.multi_reduction <add>, %22, %cst_15 [1] : vector<8x128xf32> to vector<8xf32>
    %24 = vector.shape_cast %23 : vector<8xf32> to vector<8x1xf32>
    %25 = tpu.reciprocal %24 {approx = true} : vector<8x1xf32> -> vector<8x1xf32>
    %26 = arith.mulf %24, %25 : vector<8x1xf32>
    %cst_16 = arith.constant 2.000000e+00 : f32
    %27 = vector.broadcast %cst_16 : f32 to vector<8x1xf32>
    %28 = arith.subf %27, %26 : vector<8x1xf32>
    %29 = arith.mulf %25, %28 : vector<8x1xf32>
    %30 = vector.broadcast %29 : vector<8x1xf32> to vector<8x128xf32>
    %31 = arith.mulf %22, %30 : vector<8x128xf32>
    %c0_17 = arith.constant 0 : index
    %c0_18 = arith.constant 0 : index
    %c0_19 = arith.constant 0 : index
    %32 = vector.load %arg8[%c0_17, %c0_18, %c0_19] : memref<1x8x128xf32, #tpu.memory_space<vmem>>, vector<1x8x128xf32>
    %33 = vector.shape_cast %32 : vector<1x8x128xf32> to vector<8x128xf32>
    %34 = vector.shape_cast %31 : vector<8x128xf32> to vector<1x8x128xf32>
    tpu.vector_store %arg8[%c0_17, %c0_18, %c0_19], %34 {strides = array<i32>} : memref<1x8x128xf32, #tpu.memory_space<vmem>>, vector<1x8x128xf32>,
    %cst_20 = arith.constant dense<0.000000e+00> : vector<8x128xf32>
    %35 = tpu.matmul %31, %5, %cst_20 {dimension_numbers = #tpu.dot_dimension_numbers<[1], [0], [0], [1], [0, 0, 1, 1], [], []>} : vector<8x128xf32>, vector<128x128xf32>, vector<8x128xf32> -> vector<8x128xf32>
    %c0_21 = arith.constant 0 : index
    %c0_22 = arith.constant 0 : index
    %c0_23 = arith.constant 0 : index
    %36 = vector.load %arg9[%c0_21, %c0_22, %c0_23] : memref<1x8x128xf32, #tpu.memory_space<vmem>>, vector<1x8x128xf32>
    %37 = vector.shape_cast %36 : vector<1x8x128xf32> to vector<8x128xf32>
    %38 = vector.shape_cast %35 : vector<8x128xf32> to vector<1x8x128xf32>
    tpu.vector_store %arg9[%c0_21, %c0_22, %c0_23], %38 {strides = array<i32>} : memref<1x8x128xf32, #tpu.memory_space<vmem>>, vector<1x8x128xf32>,
    return
  }
  func.func @transform_0(%arg0: i32, %arg1: i32) -> i32 {
    %c0_i32 = arith.constant 0 : i32
    %c0_i32_0 = arith.constant 0 : i32
    return %c0_i32 : i32
  }
  func.func @transform_1(%arg0: i32, %arg1: i32) -> i32 {
    %c0_i32 = arith.constant 0 : i32
    %c0_i32_0 = arith.constant 0 : i32
    return %c0_i32 : i32
  }
  func.func @transform_2(%arg0: i32, %arg1: i32) -> (i32, i32) {
    %c0_i32 = arith.constant 0 : i32
    %c0_i32_0 = arith.constant 0 : i32
    %c0_i32_1 = arith.constant 0 : i32
    return %c0_i32, %c0_i32_0 : i32, i32
  }
  func.func @transform_3(%arg0: i32, %arg1: i32) -> (i32, i32, i32) {
    %c0_i32 = arith.constant 0 : i32
    %c0_i32_0 = arith.constant 0 : i32
    return %arg0, %arg1, %c0_i32 : i32, i32, i32
  }
  func.func @transform_4(%arg0: i32, %arg1: i32) -> (i32, i32, i32) {
    %c0_i32 = arith.constant 0 : i32
    %c0_i32_0 = arith.constant 0 : i32
    %c0_i32_1 = arith.constant 0 : i32
    return %arg0, %c0_i32, %c0_i32_0 : i32, i32, i32
  }
  func.func @transform_5(%arg0: i32, %arg1: i32) -> (i32, i32, i32) {
    %c0_i32 = arith.constant 0 : i32
    %c0_i32_0 = arith.constant 0 : i32
    %c0_i32_1 = arith.constant 0 : i32
    return %arg0, %c0_i32, %c0_i32_0 : i32, i32, i32
  }
  func.func @transform_6(%arg0: i32, %arg1: i32) -> (i32, i32, i32) {
    %c0_i32 = arith.constant 0 : i32
    %c0_i32_0 = arith.constant 0 : i32
    return %arg0, %arg1, %c0_i32 : i32, i32, i32
  }
  func.func @transform_7(%arg0: i32, %arg1: i32) -> (i32, i32, i32) {
    %c0_i32 = arith.constant 0 : i32
    %c0_i32_0 = arith.constant 0 : i32
    return %arg0, %arg1, %c0_i32 : i32, i32, i32
  }
}

</mosaic_0001>

<bundles_post_ra>
// kernel: tpu_custom_call.1
= control target key start
LH: loop header
LB: loop body
LE: loop exit
PB: predicated region body
PF: predicated region fallthrough
CT: control target
= control target key end

     0   :  { %s1965_s0 = inlined_call_operand.<no memory space> [shape: f32[1], index: 0, kind: input, shape index: {}]   ;;  %s1966_s1 = inlined_call_operand.<no memory space> [shape: s32[1], index: 1, kind: input, shape index: {}]   ;;  %s1967_s2 = inlined_call_operand.hbm [shape: f32[128,128], index: 2, kind: input, shape index: {}]   ;;  %s1968_s3 = inlined_call_operand.hbm [shape: f32[2,8,128], index: 3, kind: input, shape index: {}]   ;;  %s1969_s4 = inlined_call_operand.hbm [shape: f32[2,128,128], index: 4, kind: input, shape index: {}]   ;;  %s1970_s5 = inlined_call_operand.hbm [shape: f32[2,128,128], index: 5, kind: input, shape index: {}]   ;;  %s1971_s6 = inlined_call_operand.hbm [shape: f32[2,8,128], index: 6, kind: output, shape index: {0}]   ;;  %s1972_s7 = inlined_call_operand.hbm [shape: f32[2,8,128], index: 7, kind: output, shape index: {1}]  }
   0x1   :  { %1990 = sst [smem:[#allocation25_spill]] %s1968_s3 }
   0x2   :  { %1991 = sst [smem:[#allocation26_spill]] %s1969_s4 }
   0x3   :  { %13 = sst [smem:[#allocation2]] %s1965_s0 }
   0x4   :  { %14 = sst [smem:[#allocation3]] %s1966_s1 }
   0x5   :  { %15 = vsyncpa [#allocation5], 0 }
   0x6   :  { %16 = vsyncpa [#allocation8], 0 }
   0x7   :  { %18 = vsyncpa [#allocation8 + $0x1], 0 }
   0x8   :  { %19 = vsyncpa [#allocation11], 0 }
   0x9   :  { %21 = vsyncpa [#allocation11 + $0x1], 0 }
   0xa   :  { %22 = vsyncpa [#allocation6], 0 }
   0xb   :  { %24 = vsyncpa [#allocation6 + $0x1], 0 }
   0xc   :  { %25 = vsyncpa [#allocation14], 0 }
   0xd   :  { %27 = vsyncpa [#allocation14 + $0x1], 0  ;;  %s1553_s28 = smov 0   ;;  %s1555_s29 = smov 0  }
   0xe   :  { %s1557_s30 = smov 0   ;;  %s1559_s0 = smov 0  }
   0xf   :  { %s1561_s8 = smov 0   ;;  %s1563_s1 = smov 0  }
  0x10 LB: > { %1992 = sst [smem:[#allocation20_spill]] %s1482_s30  ;;  %s45_s9 = sadd.s32 1, %s1490_s8  ;;  %s1494_s1 = sphi %s1563_s1, %s33_s1   ;;  %s1490_s8 = sphi %s1561_s8, %s2029_s8   ;;  %s1486_s0 = sphi %s1559_s0, %s2028_s0   ;;  %s1482_s30 = sphi %s1557_s30, %s2024_s30   ;;  %s1478_s29 = sphi %s1555_s29, %s2027_s29   ;;  %s1474_s28 = sphi %s1553_s28, %s2026_s28  }
  0x11   : > { %1993 = sst [smem:[#allocation21_spill]] %s1494_s1  ;;  %s117_s10 = sadd.s32 1, %s1482_s30 }
  0x12   : > { %p47_p0 = scmp.ge.s32.totalorder %s45_s9, 2  ;;  %p1973_p1 = scmp.ne.s32.totalorder %s1482_s30, %s1478_s29 }
  0x13   : > { %p125_p2 = scmp.eq.s32.totalorder %s1494_s1, 0  ;;  %p1193_p5 = scmp.lt.s32.totalorder %s1494_s1, 2 }
  0x14   : > { %s2031_s9 = smov (%p47_p0, %s45_s9), 0  ;;  %s281_s12 = sand.u32 1, %s1494_s1  }
  0x15   : > { %1994 = sst [smem:[#allocation22_spill]] %s2031_s9  ;;  %p126_p4 = por %p125_p2, %p1973_p1 }
  0x16   : > { %s112_s11 = ssub.s32 %s1490_s8, %s2031_s9  ;;  %s1599_s13 = sand.u32 1, %s1482_s30  }
  0x17   : > { %p115_p6 = scmp.eq.s32.totalorder %s112_s11, 0  ;;  %s907_s14 = sshll.u32 %s1490_s8, 7 }
  0x18   : > { %s906_s16 = sshll.u32 %s1599_s13, 3  ;;  %s1996_s3 = sld [smem:[#allocation25_spill]] }
  0x19   : > { %s1603_s15 = scalar_select %p115_p6, %s1482_s30, %s117_s10  }
  0x1a   : > { %p1611_p7 = pnand %p1193_p5, %p126_p4  ;;  %s285_s21 = scalar_lea.vmem [#allocation7], %s906_s16 }
  0x1b   : > { %1995 = sst [smem:[#allocation23_spill]] %s1603_s15  ;;  %s293_s22 = sshll.u32 %s285_s21, 4  ;;  %s1616_s22 = int_to_ptr.vmem [resolvable:$true] %s293_s22 }
  0x1c   : > { %s1997_s20 = scalar_select %p1611_p7, 1, 0 }
  0x1d   : > { %s1974_s23 = sshll.u32 %s1599_s13, 7  ;;  %s1618_s24 = scalar_lea.sflag [#allocation8], %s281_s12 }
  0x1e   : > { %s1609_s19 = scalar_lea.hbm %s1996_s3, %s907_s14  ;;  %p1624_p9 = pneg %p1611_p7 }
  0x1f   : > { %s1254_s25 = scalar_lea.hbm %s1609_s19, 128  ;;  %s1259_s11 = scalar_lea.hbm %s1996_s3, 256 }
  0x20   : > { %p1255_p8 = scmp.ne.s32.totalorder %s1609_s19, %s1254_s25  ;;  %p1260_p12 = scmp.lt.u32.totalorder %s1609_s19, %s1996_s3 }
  0x21   : > { %s1998_s26 = scalar_select %p1624_p9, 1, 0 }
  0x22   : > { %p1257_p10 = pnand %p1624_p9, %p1255_p8  ;;  %p1261_p13 = scmp.lt.u32.totalorder %s1259_s11, %s1254_s25 }
  0x23   : > { %p1263_p2 = scmp.lt.u32.totalorder %s1254_s25, %s1609_s19 }
  0x24   : > { %p1258_p11 = pneg %p1257_p10  ;;  %p1262_p0 = por %p1261_p13, %p1260_p12 }
  0x26   : > { %p1264_p4 = por %p1263_p2, %p1262_p0 }
  0x28   : > { %p1265_p5 = pnand %p1264_p4, %p1258_p11 }
  0x2a   : > { %1268 = shalt.err (!%p1265_p5)
}
  0x2b   : > { %s1269_s12 = scalar_lea.vmem %s1616_s22, 128  ;;  %s1496_s17 = smov [#allocation7]  }
  0x2c   : > { %p1270_p6 = scmp.ne.s32.totalorder %s1616_s22, %s1269_s12  ;;  %s1274_s18 = sshll.u32 %s1496_s17, 4  ;;  %s1275_s18 = int_to_ptr.vmem [resolvable:$false] %s1274_s18 }
  0x2d   : > { %s1276_s21 = scalar_lea.vmem %s1275_s18, 256  ;;  %p1277_p3 = scmp.lt.s32.totalorder %s1616_s22, %s1275_s18 }
  0x2e   : > { %p1272_p8 = pnand %p1270_p6, %p1624_p9  ;;  %p1278_p1 = scmp.lt.s32.totalorder %s1276_s21, %s1269_s12 }
  0x30   : > { %p1273_p10 = pneg %p1272_p8  ;;  %p1279_p12 = por %p1278_p1, %p1277_p3 }
  0x32   : > { %p1280_p13 = pnand %p1279_p12, %p1273_p10 }
  0x34   : > { %1283 = shalt.err (!%p1280_p13)
}
  0x35   : > { %1178 = dma.hbm_to_vmem [thread:$0]  (!%p1611_p7), %s1609_s19, 128, %s1616_s22, %s1618_s24  }
  0x36   : > { %s927_s25 = sshll.u32 %s1490_s8, 11  ;;  %s304_s27 = scalar_lea.vmem [#allocation9], %s1974_s23 }
  0x37   : > { %s311_s10 = sshll.u32 %s304_s27, 4  ;;  %s1654_s11 = sadd.s32 4294967295, %s1494_s1   ;;  %s1651_s10 = int_to_ptr.vmem [resolvable:$true] %s311_s10 }
  0x38   : > { %s902_s14 = sadd.s32 4294967294, %s1494_s1   ;;  %p130_p1 = scmp.ne.s32.totalorder %s1478_s29, %s1474_s28 }
  0x39   : > { %p1977_p3 = scmp.eq.s32.totalorder %s1654_s11, 0  ;;  %p208_p11 = scmp.eq.s32.totalorder %s1654_s11, 1 }
  0x3a   : > { %p214_p0 = scmp.eq.s32.totalorder %s902_s14, 1  ;;  %p903_p4 = scmp.ge.s32.totalorder %s1494_s1, 1 }
  0x3b   : > { %p1663_p2 = por %p1977_p3, %p130_p1  ;;  %p2000_p5 = scmp.ne.s32.totalorder %s1482_s30, %s1478_s29 }
  0x3c   : > { %p1675_p8 = por %p214_p0, %p130_p1  ;;  %p249_p10 = scmp.lt.s32.totalorder %s1494_s1, 3 }
  0x3d   : > { %s1999_s19 = scalar_select %p1663_p2, 1, 0 }
  0x3e   : > { %p1671_p6 = por %p208_p11, %p2000_p5  ;;  %p1680_p12 = pnand %p903_p4, %p249_p10 }
  0x3f   : > { %s2002_s16 = scalar_select %p1675_p8, 1, 0 }
  0x40   : > { %s2001_s22 = scalar_select %p1671_p6, 1, 0 }
  0x41   : > { %2003 = sst [smem:[#allocation24_spill]] %s2002_s16  ;;  %s1497_s17 = smov [#allocation4]  }
  0x42   : > { %s2004_s12 = scalar_select %p1680_p12, 1, 0 }
  0x43   : > { %s267_s18 = sshll.u32 %s1497_s17, 4  ;;  %s2005_s4 = sld [smem:[#allocation26_spill]]  ;;  %s1684_s18 = int_to_ptr.vmem [resolvable:$true] %s267_s18 }
  0x49   : > { %s1693_s14 = scalar_lea.hbm %s2005_s4, %s927_s25  ;;  %s1289_s9 = scalar_lea.hbm %s2005_s4, 4096 }
  0x4a   : > { %s1284_s23 = scalar_lea.hbm %s1693_s14, 2048  ;;  %p1290_p4 = scmp.lt.u32.totalorder %s1693_s14, %s2005_s4 }
  0x4b   : > { %p1285_p1 = scmp.ne.s32.totalorder %s1693_s14, %s1284_s23  ;;  %p1291_p5 = scmp.lt.u32.totalorder %s1289_s9, %s1284_s23 }
  0x4c   : > { %p1293_p13 = scmp.lt.u32.totalorder %s1284_s23, %s1693_s14 }
  0x4d   : > { %p1287_p11 = pnand %p1285_p1, %p1624_p9  ;;  %p1292_p10 = por %p1291_p5, %p1290_p4 }
  0x4f   : > { %p1288_p0 = pneg %p1287_p11  ;;  %p1294_p3 = por %p1293_p13, %p1292_p10 }
  0x51   : > { %p1295_p8 = pnand %p1294_p3, %p1288_p0 }
  0x53   : > { %1298 = shalt.err (!%p1295_p8)
}
  0x54   : > { %s1299_s21 = scalar_lea.vmem %s1651_s10, 2048  ;;  %s1498_s3 = smov [#allocation9]  }
  0x55   : > { %p1300_p1 = scmp.ne.s32.totalorder %s1651_s10, %s1299_s21  ;;  %s1304_s27 = sshll.u32 %s1498_s3, 4  ;;  %s1305_s27 = int_to_ptr.vmem [resolvable:$false] %s1304_s27 }
  0x56   : > { %s1306_s30 = scalar_lea.vmem %s1305_s27, 4096  ;;  %p1307_p2 = scmp.lt.s32.totalorder %s1651_s10, %s1305_s27 }
  0x57   : > { %p1302_p11 = pnand %p1300_p1, %p1624_p9  ;;  %p1308_p12 = scmp.lt.s32.totalorder %s1306_s30, %s1299_s21 }
  0x59   : > { %p1303_p6 = pneg %p1302_p11  ;;  %p1309_p4 = por %p1308_p12, %p1307_p2 }
  0x5b   : > { %p1310_p5 = pnand %p1309_p4, %p1303_p6 }
  0x5d   : > { %1313 = shalt.err (!%p1310_p5)
}
  0x5e   : > { %s1985_s9 = smov 128   ;;  %s1500_s15 = smov 8  }
  0x5f   : > { %1181 = dma.hbm_to_vmem [thread:$0]  (!%p1611_p7), %s1693_s14, 2048, %s1651_s10, %s1618_s24, %s1985_s9, %s1985_s9, %s1500_s15  }
  0x60   : > { %p2006_p3 = scmp.eq.s32.totalorder %s1654_s11, 0  ;;  %p2007_p8 = scmp.ne.s32.totalorder %s2004_s12, 0 }
  0x61   : > { %s1734_s3 = scalar_lea.hbm %s1970_s5, %s927_s25  ;;  %s2010_s27 = sshll.u32 %s1599_s13, 7 }
  0x62   : > { %p2008_p2 = pneg %p2007_p8  ;;  %s325_s30 = scalar_lea.vmem [#allocation10], %s2010_s27 }
  0x63   : > { %s332_s4 = sshll.u32 %s325_s30, 4  ;;  %s1314_s24 = scalar_lea.hbm %s1967_s2, 2048  ;;  %s1762_s4 = int_to_ptr.vmem [resolvable:$true] %s332_s4 }
  0x64   : > { %p1725_p6 = pnand %p2008_p2, %p2006_p3  ;;  %p1315_p12 = scmp.ne.s32.totalorder %s1967_s2, %s1314_s24 }
  0x65   : > { %p1321_p1 = scmp.lt.u32.totalorder %s1314_s24, %s1967_s2 }
  0x66   : > { %p1316_p13 = pneg %p1725_p6 }
  0x68   : > { %p1317_p0 = pnand %p1316_p13, %p1315_p12 }
  0x6a   : > { %p1318_p10 = pneg %p1317_p0 }
  0x6c   : > { %p1323_p11 = pnand %p1321_p1, %p1318_p10 }
  0x6e   : > { %1326 = shalt.err (!%p1323_p11)
}
  0x6f   : > { %s1327_s25 = scalar_lea.vmem %s1684_s18, 2048  ;;  %p1335_p2 = scmp.lt.s32.totalorder %s1684_s18, %s1684_s18 }
  0x70   : > { %p1328_p4 = scmp.ne.s32.totalorder %s1684_s18, %s1327_s25  ;;  %p1336_p8 = scmp.lt.s32.totalorder %s1327_s25, %s1327_s25 }
  0x72   : > { %p1330_p5 = pnand %p1328_p4, %p1316_p13  ;;  %p1337_p7 = por %p1336_p8, %p1335_p2 }
  0x74   : > { %p1331_p3 = pneg %p1330_p5 }
  0x76   : > { %p1338_p9 = pnand %p1337_p7, %p1331_p3 }
  0x78   : > { %1341 = shalt.err (!%p1338_p9)
}
  0x79   : > { %s2011_s1 = smov 128   ;;  %s322_s21 = scalar_lea.sflag [#allocation11], %s1599_s13 }
  0x7a   : > { %1174 = dma.hbm_to_vmem [thread:$0]  (!%p1725_p6), %s1967_s2, 2048, %s1684_s18, [#allocation5], %s2011_s1, %s2011_s1, %s1500_s15  }
  0x7b   : > { %s1342_s27 = scalar_lea.hbm %s1734_s3, 2048  ;;  %p2012_p9 = scmp.ne.s32.totalorder %s1998_s26, 0 }
  0x7c   : > { %p1343_p7 = scmp.ne.s32.totalorder %s1734_s3, %s1342_s27  ;;  %s1347_s24 = scalar_lea.hbm %s1970_s5, 4096 }
  0x7d   : > { %p1348_p13 = scmp.lt.u32.totalorder %s1734_s3, %s1970_s5  ;;  %p1349_p0 = scmp.lt.u32.totalorder %s1347_s24, %s1342_s27 }
  0x7e   : > { %p1345_p8 = pnand %p1343_p7, %p2012_p9  ;;  %p1351_p1 = scmp.lt.u32.totalorder %s1342_s27, %s1734_s3 }
  0x7f   : > { %p1350_p10 = por %p1349_p0, %p1348_p13 }
  0x80   : > { %p1346_p12 = pneg %p1345_p8 }
  0x81   : > { %p1352_p6 = por %p1351_p1, %p1350_p10 }
  0x83   : > { %p1353_p11 = pnand %p1352_p6, %p1346_p12 }
  0x85   : > { %1356 = shalt.err (!%p1353_p11)
}
  0x86   : > { %s1357_s18 = scalar_lea.vmem %s1762_s4, 2048  ;;  %s1501_s17 = smov [#allocation10]  }
  0x87   : > { %p1358_p4 = scmp.ne.s32.totalorder %s1762_s4, %s1357_s18  ;;  %s1362_s25 = sshll.u32 %s1501_s17, 4  ;;  %s1363_s25 = int_to_ptr.vmem [resolvable:$false] %s1362_s25 }
  0x88   : > { %s1364_s16 = scalar_lea.vmem %s1363_s25, 4096  ;;  %p1365_p2 = scmp.lt.s32.totalorder %s1762_s4, %s1363_s25 }
  0x89   : > { %p1360_p5 = pnand %p1358_p4, %p2012_p9  ;;  %p1366_p7 = scmp.lt.s32.totalorder %s1364_s16, %s1357_s18 }
  0x8b   : > { %p1361_p3 = pneg %p1360_p5  ;;  %p1367_p8 = por %p1366_p7, %p1365_p2 }
  0x8d   : > { %p1368_p13 = pnand %p1367_p8, %p1361_p3 }
  0x8f   : > { %1371 = shalt.err (!%p1368_p13)
}
  0x90   : > { %p2013_p12 = scmp.ne.s32.totalorder %s1997_s20, 0  ;;  %p2014_p9 = scmp.ne.s32.totalorder %s2004_s12, 0 }
  0x91   : > { %p2015_p0 = scmp.eq.s32.totalorder (!%p2014_p9), %s1654_s11, 0 }
  0x92   : > { %1184 = dma.hbm_to_vmem [thread:$0]  (!%p2013_p12), %s1734_s3, 2048, %s1762_s4, %s322_s21, %s2011_s1, %s2011_s1, %s1500_s15  }
  0x93   : > { %344 = sbr.rel (%p2014_p9) target bundleno = 1168 (0x490), region = 44 }
  0x9a   : > { %1453 = dma.done.wait (%p2015_p0), [#allocation5], 2048   ;;  %p2016_p10 = pmov %p2015_p0 }
  0x9b   : > { %s350_s20 = sand.u32 1, %s1654_s11   ;;  %s1799_s26 = sand.u32 1, %s1478_s29  }
  0x9c   : > { %1455 = vsyncadd (%p2016_p10), [#allocation5], 4294965248  ;;  %s1802_s13 = sshll.u32 %s1799_s26, 3  ;;  %s351_s4 = scalar_lea.sflag [#allocation8], %s350_s20 }
  0x9d   : > { %s354_s15 = scalar_lea.vmem [#allocation7], %s1802_s13  ;;  %p2017_p1 = scmp.ne.s32.totalorder %s1999_s19, 0 }
  0x9f   : > { %1457 = dma.done.wait (%p2017_p1), %s351_s4, 2176  }
  0xa0   : > { %1459 = vsyncadd (%p2017_p1), %s351_s4, 4294965120  ;;  %s917_s12 = sshll.u32 %s1799_s26, 7  ;;  %s369_s11 = scalar_lea.sflag [#allocation11], %s1799_s26 }
  0xa1   : > { %s1810_s3 = scalar_lea.vmem [#allocation9], %s917_s12  ;;  %s1813_s1 = scalar_lea.vmem [#allocation10], %s917_s12 }
  0xa2   : > { %1461 = dma.done.wait (%p2017_p1), %s369_s11, 2048  }
  0xa3   : > { %1463 = vsyncadd (%p2017_p1), %s369_s11, 4294965248  ;;  %v1502_v0 = vmov 0.0|0.0   ;;  %vm1503_vm0 = vmmov 0   ;;  %v1504_v1 = vmov 0.0   ;;  %v451_v2 = vld [vmem:[#allocation4] sm:$0xff]  ;;  %v452_v3 = vld [vmem:[#allocation4 + $0x8] sm:$0xff]  ;;  %v609_v53 = vlaneseq }
  0xa4   : > { %1085 = vmatprep.subr.bf16.mxu0 %v1502_v0  ;;  %1012 = vmatprep.mubr.msk.f32.mxu0 %vm1503_vm0, %v1504_v1  ;;  %v453_v4 = vld [vmem:[#allocation4 + $0x10] sm:$0xff]  ;;  %v1086_v5 = vpack.c.bf16 %v452_v3, %v451_v2  ;;  %v454_v6 = vld [vmem:[#allocation4 + $0x18] sm:$0xff]  ;;  %v455_v8 = vld [vmem:[#allocation4 + $0x20] sm:$0xff]  ;;  %s611_s19 = sld [smem:[#allocation3]]  ;;  %s410_s21 = scalar_lea.vmem [#allocation12], %s1802_s13 }
  0xa5   : > { %1109 = vmatprep.subr.bf16.mxu1 %v1502_v0  ;;  %1047 = vmatprep.mubr.msk.f32.mxu1 %vm1503_vm0, %v1504_v1  ;;  %v1089_v7 = vpack.c.bf16 %v454_v6, %v453_v4  ;;  %v456_v9 = vld [vmem:[#allocation4 + $0x28] sm:$0xff]  ;;  %v419_v10 = vld [vmem:[%s1810_s3] sm:$0xff]  ;;  %v420_v11 = vld [vmem:[%s1810_s3 + $0x8] sm:$0xff]  ;;  %s537_s9 = sld [smem:[#allocation2]]  ;;  %v610_v54 = vand.u32 127, %v609_v53  ;;  %s923_s27 = sshll.u32 %s1486_s0, 7 }
  0xa6   : > { %1087 = vmatpush3.bf16.msra.mxu0 %v1086_v5  ;;  %v1092_v12 = vpack.c.bf16 %v456_v9, %v455_v8  ;;  %v1110_v13 = vpack.c.bf16 %v420_v11, %v419_v10  ;;  %v457_v14 = vld [vmem:[#allocation4 + $0x30] sm:$0xff]  ;;  %v458_v15 = vld [vmem:[#allocation4 + $0x38] sm:$0xff]  ;;  %v421_v16 = vld [vmem:[%s1810_s3 + $0x10] sm:$0xff]  ;;  %s1890_s24 = scalar_lea.hbm %s1971_s6, %s923_s27  ;;  %s719_s10 = sshll.u32 %s410_s21, 4  ;;  %s720_s10 = int_to_ptr.vmem [resolvable:$true] %s719_s10 }
  0xa7   : > { %1088 = vmatprep.subr.bf16.mxu0 %v1502_v0  ;;  %v422_v17 = vld [vmem:[%s1810_s3 + $0x18] sm:$0xff]  ;;  %v1095_v18 = vpack.c.bf16 %v458_v15, %v457_v14  ;;  %v459_v19 = vld [vmem:[#allocation4 + $0x40] sm:$0xff]  ;;  %v461_v23 = vld [vmem:[#allocation4 + $0x50] sm:$0xff]  ;;  %s700_s14 = scalar_lea.sflag [#allocation6], %s1799_s26  ;;  %s1372_s18 = scalar_lea.vmem %s720_s10, 128 }
  0xa8   : > { %1111 = vmatpush3.bf16.xpose.msra.mxu1 %v1110_v13  ;;  %v460_v20 = vld [vmem:[#allocation4 + $0x48] sm:$0xff]  ;;  %v1113_v21 = vpack.c.bf16 %v422_v17, %v421_v16  ;;  %v462_v24 = vld [vmem:[#allocation4 + $0x58] sm:$0xff]  ;;  %v423_v25 = vld [vmem:[%s1810_s3 + $0x20] sm:$0xff]  ;;  %p1373_p6 = scmp.ne.s32.totalorder %s720_s10, %s1372_s18  ;;  %p2018_p11 = scmp.ne.s32.totalorder %s2001_s22, 0 }
  0xa9   : > { %1112 = vmatprep.subr.bf16.mxu1 %v1502_v0  ;;  %v1098_v22 = vpack.c.bf16 %v460_v20, %v459_v19  ;;  %v424_v26 = vld [vmem:[%s1810_s3 + $0x28] sm:$0xff]  ;;  %v1101_v27 = vpack.c.bf16 %v462_v24, %v461_v23  ;;  %v463_v28 = vld [vmem:[#allocation4 + $0x60] sm:$0xff]  ;;  %v464_v29 = vld [vmem:[#allocation4 + $0x68] sm:$0xff]  ;;  %s1505_s17 = smov [#allocation12]  }
  0xaa   : > { %1090 = vmatpush3.bf16.msra.mxu0 %v1089_v7  ;;  %v1116_v30 = vpack.c.bf16 %v424_v26, %v423_v25  ;;  %v1104_v31 = vpack.c.bf16 %v464_v29, %v463_v28  ;;  %v465_v32 = vld [vmem:[#allocation4 + $0x70] sm:$0xff]  ;;  %v466_v33 = vld [vmem:[#allocation4 + $0x78] sm:$0xff]  ;;  %v425_v34 = vld [vmem:[%s1810_s3 + $0x30] sm:$0xff]  ;;  %v612_v55 = vstv %s611_s19  ;;  %p1374_p4 = pnand %p1373_p6, %p2018_p11  ;;  %s1376_s25 = sshll.u32 %s1505_s17, 4  ;;  %s1377_s25 = int_to_ptr.vmem [resolvable:$false] %s1376_s25 }
  0xab   : > { %1091 = vmatprep.subr.bf16.mxu0 %v1502_v0  ;;  %v426_v35 = vld [vmem:[%s1810_s3 + $0x38] sm:$0xff]  ;;  %v1107_v36 = vpack.c.bf16 %v466_v33, %v465_v32  ;;  %v427_v39 = vld [vmem:[%s1810_s3 + $0x40] sm:$0xff]  ;;  %v428_v40 = vld [vmem:[%s1810_s3 + $0x48] sm:$0xff]  ;;  %v538_v56 = vstv %s537_s9  ;;  %vm613_vm1 = vcmp.lt.s32.totalorder %v610_v54, %v612_v55  ;;  %s1378_s16 = scalar_lea.vmem %s1377_s25, 256  ;;  %p1379_p3 = scmp.lt.s32.totalorder %s720_s10, %s1377_s25 }
  0xac   : > { %v1119_v37 = vpack.c.bf16 %v426_v35, %v425_v34  ;;  %v418_v38 = vld [vmem:[%s354_s15] sm:$0xff]  ;;  %v1122_v41 = vpack.c.bf16 %v428_v40, %v427_v39  ;;  %v431_v45 = vld [vmem:[%s1810_s3 + $0x60] sm:$0xff]  ;;  %v432_v46 = vld [vmem:[%s1810_s3 + $0x68] sm:$0xff]  ;;  %p1375_p5 = pneg %p1374_p4  ;;  %p1380_p2 = scmp.lt.s32.totalorder %s1378_s16, %s1372_s18 }
  0xad   : > { %v429_v42 = vld [vmem:[%s1810_s3 + $0x50] sm:$0xff]  ;;  %v430_v43 = vld [vmem:[%s1810_s3 + $0x58] sm:$0xff]  ;;  %v1128_v47 = vpack.c.bf16 %v432_v46, %v431_v45  ;;  %v435_v61 = vld [vmem:[%s1813_s1] sm:$0xff] }
  0xae   : > { %1093 = vmatpush3.bf16.msra.mxu0 %v1092_v12  ;;  %v1125_v44 = vpack.c.bf16 %v430_v43, %v429_v42  ;;  %v433_v48 = vld [vmem:[%s1810_s3 + $0x70] sm:$0xff]  ;;  %v434_v49 = vld [vmem:[%s1810_s3 + $0x78] sm:$0xff]  ;;  %v436_v62 = vld [vmem:[%s1813_s1 + $0x8] sm:$0xff]  ;;  %p1381_p7 = por %p1380_p2, %p1379_p3 }
  0xaf   : > { %1094 = vmatprep.subr.bf16.mxu0 %v1502_v0  ;;  %v1131_v50 = vpack.c.bf16 %v434_v49, %v433_v48  ;;  %v437_v63 = vld [vmem:[%s1813_s1 + $0x10] sm:$0xff]  ;;  %v438_v2 = vld [vmem:[%s1813_s1 + $0x18] sm:$0xff]  ;;  %v439_v4 = vld [vmem:[%s1813_s1 + $0x20] sm:$0xff] }
  0xb0   : > { %1114 = vmatpush3.bf16.xpose.msra.mxu1 %v1113_v21  ;;  %v1137_v3 = vpack.c.bf16 %v438_v2, %v437_v63  ;;  %v440_v5 = vld [vmem:[%s1813_s1 + $0x28] sm:$0xff]  ;;  %v441_v11 = vld [vmem:[%s1813_s1 + $0x30] sm:$0xff]  ;;  %v442_v12 = vld [vmem:[%s1813_s1 + $0x38] sm:$0xff]  ;;  %p1382_p8 = pnand %p1381_p7, %p1375_p5 }
  0xb1   : > { %1115 = vmatprep.subr.bf16.mxu1 %v1502_v0  ;;  %v1140_v6 = vpack.c.bf16 %v440_v5, %v439_v4  ;;  %v1143_v13 = vpack.c.bf16 %v442_v12, %v441_v11  ;;  %v443_v14 = vld [vmem:[%s1813_s1 + $0x40] sm:$0xff]  ;;  %v444_v15 = vld [vmem:[%s1813_s1 + $0x48] sm:$0xff]  ;;  %v445_v17 = vld [vmem:[%s1813_s1 + $0x50] sm:$0xff] }
  0xb2   : > { %1096 = vmatpush3.bf16.msra.mxu0 %v1095_v18  ;;  %v1146_v16 = vpack.c.bf16 %v444_v15, %v443_v14  ;;  %v446_v18 = vld [vmem:[%s1813_s1 + $0x58] sm:$0xff]  ;;  %v447_v20 = vld [vmem:[%s1813_s1 + $0x60] sm:$0xff]  ;;  %v448_v21 = vld [vmem:[%s1813_s1 + $0x68] sm:$0xff] }
  0xb3   : > { %1097 = vmatprep.subr.bf16.mxu0 %v1502_v0  ;;  %v1149_v19 = vpack.c.bf16 %v446_v18, %v445_v17  ;;  %v449_v23 = vld [vmem:[%s1813_s1 + $0x70] sm:$0xff]  ;;  %v450_v24 = vld [vmem:[%s1813_s1 + $0x78] sm:$0xff] }
  0xb4   : > { %v1155_v25 = vpack.c.bf16 %v450_v24, %v449_v23 }
  0xb6   : > { %1099 = vmatpush3.bf16.msra.mxu0 %v1098_v22  ;;  %v1152_v22 = vpack.c.bf16 %v448_v21, %v447_v20 }
  0xb7   : > { %1100 = vmatprep.subr.bf16.mxu0 %v1502_v0 }
  0xb8   : > { %1117 = vmatpush3.bf16.xpose.msra.mxu1 %v1116_v30 }
  0xb9   : > { %1118 = vmatprep.subr.bf16.mxu1 %v1502_v0 }
  0xba   : > { %1102 = vmatpush3.bf16.msra.mxu0 %v1101_v27 }
  0xbb   : > { %1103 = vmatprep.subr.bf16.mxu0 %v1502_v0 }
  0xbe   : > { %1105 = vmatpush3.bf16.msra.mxu0 %v1104_v31 }
  0xbf   : > { %1106 = vmatprep.subr.bf16.mxu0 %v1502_v0 }
  0xc0   : > { %1120 = vmatpush3.bf16.xpose.msra.mxu1 %v1119_v37 }
  0xc1   : > { %1121 = vmatprep.subr.bf16.mxu1 %v1502_v0 }
  0xc2   : > { %1108 = vmatpush3.bf16.msra.mxu0 %v1107_v36 }
  0xc3   : > { %1133 = vmatprep.subr.bf16.mxu0 %v1502_v0 }
  0xc5   : > { %1013 = vmatmul.mubr.f32.vlgmr.msra.gmra.mrb[0].mxu0 %v418_v38 }
  0xc6   : > { %1082 = vmatprep.mubr.msk.f32.mxu0 %vm1503_vm0, %v1504_v1  ;;  %v1134_v1 = vpack.c.bf16 %v436_v62, %v435_v61 }
  0xc8   : > { %1123 = vmatpush3.bf16.xpose.msra.mxu1 %v1122_v41  ;;  %1135 = vmatpush3.bf16.msra.mxu0 %v1134_v1 }
  0xc9   : > { %1124 = vmatprep.subr.bf16.mxu1 %v1502_v0  ;;  %1136 = vmatprep.subr.bf16.mxu0 %v1502_v0 }
  0xcc   : > { %1138 = vmatpush3.bf16.msra.mxu0 %v1137_v3 }
  0xcd   : > { %1139 = vmatprep.subr.bf16.mxu0 %v1502_v0 }
  0xd0   : > { %1126 = vmatpush3.bf16.xpose.msra.mxu1 %v1125_v44  ;;  %1141 = vmatpush3.bf16.msra.mxu0 %v1140_v6 }
  0xd1   : > { %1127 = vmatprep.subr.bf16.mxu1 %v1502_v0  ;;  %1142 = vmatprep.subr.bf16.mxu0 %v1502_v0 }
  0xd4   : > { %1144 = vmatpush3.bf16.msra.mxu0 %v1143_v13 }
  0xd5   : > { %1145 = vmatprep.subr.bf16.mxu0 %v1502_v0 }
  0xd8   : > { %1129 = vmatpush3.bf16.xpose.msra.mxu1 %v1128_v47  ;;  %1147 = vmatpush3.bf16.msra.mxu0 %v1146_v16 }
  0xd9   : > { %1130 = vmatprep.subr.bf16.mxu1 %v1502_v0  ;;  %1148 = vmatprep.subr.bf16.mxu0 %v1502_v0 }
  0xdc   : > { %1150 = vmatpush3.bf16.msra.mxu0 %v1149_v19 }
  0xdd   : > { %1151 = vmatprep.subr.bf16.mxu0 %v1502_v0 }
  0xe0   : > { %1132 = vmatpush3.bf16.xpose.msra.mxu1 %v1131_v50  ;;  %1153 = vmatpush3.bf16.msra.mxu0 %v1152_v22 }
  0xe1   : > { %1154 = vmatprep.subr.bf16.mxu0 %v1502_v0 }
  0xe4   : > { %1156 = vmatpush3.bf16.msra.mxu0 %v1155_v25 }
 0x198   : > { %v533_v51 = vpop.f32.mrb[0].mxu0 }
 0x199   : > { %v1014_v52 = vpop.f32.mrb[1].mxu0  ;;  %1048 = vmatmul.mubr.f32.vlgmr.msra.gmra.mrb[0].mxu1 %v533_v51 }
 0x26c   : > { %v605_v57 = vpop.f32.mrb[0].mxu1 }
 0x26d   : > { %v606_v58 = vadd.f32 %v605_v57, %v538_v56  ;;  %v1049_v59 = vpop.f32.mrb[1].mxu1 }
 0x26f   : > { %v614_v60 = vsel %vm613_vm1, %v606_v58, -3.4028235e+38 }
 0x270   : > { %615 = vmax.xlane.f32.xlu0 %v614_v60 }
 0x2fd   : > { %v616_v7 = vpop.xlane.xlu0 %615 }
 0x2fe   : > { %v617_v8 = vsub.f32 %v614_v60, %v616_v7 }
 0x300   : > { %v618_v9 = vmul.f32 1.442695, %v617_v8 }
 0x302   : > { %1250 = vpow2.f32 %v618_v9 }
 0x30c   : > { %v1251_v10 = vpop.eup %1250 }
 0x30d   : > { %620 = vadd.xlane.f32.xlu0 %v1251_v10 }
 0x39a   : > { %v621_v26 = vpop.xlane.xlu0 %620 }
 0x39b   : > { %1252 = vrcp.f32 %v621_v26 }
 0x3a5   : > { %v1253_v27 = vpop.eup %1252 }
 0x3a6   : > { %v623_v28 = vmul.f32 %v1253_v27, %v621_v26 }
 0x3a8   : > { %v624_v29 = vsub.f32 2.0, %v623_v28 }
 0x3aa   : > { %v625_v30 = vmul.f32 %v1253_v27, %v624_v29 }
 0x3ac   : > { %v626_v31 = vmul.f32 %v1251_v10, %v625_v30 }
 0x3ae   : > { %1083 = vmatmul.mubr.f32.vlgmr.msra.gmra.mrb[2].mxu0 %v626_v31  ;;  %627 = vst [vmem:[%s410_s21] sm:$0xff] %v626_v31 }
 0x3af   : > { %1385 = shalt.err (!%p1382_p8)
}
 0x3b0   : > { %s1386_s20 = scalar_lea.hbm %s1890_s24, 128  ;;  %s1390_s12 = scalar_lea.hbm %s1971_s6, 256 }
 0x3b1   : > { %p1387_p13 = scmp.ne.s32.totalorder %s1890_s24, %s1386_s20  ;;  %p1391_p0 = scmp.lt.u32.totalorder %s1890_s24, %s1971_s6 }
 0x3b2   : > { %p1392_p10 = scmp.lt.u32.totalorder %s1390_s12, %s1386_s20  ;;  %p1394_p6 = scmp.lt.u32.totalorder %s1386_s20, %s1890_s24 }
 0x3b3   : > { %p1388_p12 = pnand %p1387_p13, %p2018_p11 }
 0x3b4   : > { %p1393_p1 = por %p1392_p10, %p1391_p0 }
 0x3b5   : > { %p1389_p9 = pneg %p1388_p12 }
 0x3b6   : > { %p1395_p4 = por %p1394_p6, %p1393_p1 }
 0x3b8   : > { %p1396_p5 = pnand %p1395_p4, %p1389_p9 }
 0x3ba   : > { %1399 = shalt.err (!%p1396_p5)
}
 0x3bb   : > { %1167 = dma.vmem_to_hbm [thread:$0]  (%p2018_p11), %s720_s10, 128, %s1890_s24, %s700_s14  }
 0x3bc   : > { %s417_s1 = scalar_lea.vmem [#allocation13], %s1802_s13  ;;  %s1918_s23 = scalar_lea.hbm %s1972_s7, %s923_s27 }
 0x3bd   : > { %s733_s19 = sshll.u32 %s417_s1, 4  ;;  %s705_s30 = scalar_lea.sflag [#allocation14], %s1799_s26  ;;  %s1911_s19 = int_to_ptr.vmem [resolvable:$true] %s733_s19 }
 0x3be   : > { %s1400_s18 = scalar_lea.vmem %s1911_s19, 128  ;;  %s1506_s13 = smov [#allocation13]  }
 0x3bf   : > { %p1401_p3 = scmp.ne.s32.totalorder %s1911_s19, %s1400_s18  ;;  %s1404_s24 = sshll.u32 %s1506_s13, 4  ;;  %s1405_s24 = int_to_ptr.vmem [resolvable:$false] %s1404_s24 }
 0x3c0   : > { %s1406_s0 = scalar_lea.vmem %s1405_s24, 256  ;;  %p1407_p8 = scmp.lt.s32.totalorder %s1911_s19, %s1405_s24 }
 0x3c1   : > { %p1402_p2 = pnand %p1401_p3, %p2018_p11  ;;  %p1408_p13 = scmp.lt.s32.totalorder %s1406_s0, %s1400_s18 }
 0x3c3   : > { %p1403_p7 = pneg %p1402_p2  ;;  %p1409_p12 = por %p1408_p13, %p1407_p8 }
 0x3c5   : > { %p1410_p9 = pnand %p1409_p12, %p1403_p7 }
 0x481   : > { %v694_v0 = vpop.f32.mrb[2].mxu0 }
 0x482   : > { %698 = vst [vmem:[%s417_s1] sm:$0xff] %v694_v0  ;;  %v1084_v32 = vpop.f32.mrb[3].mxu0 }
 0x483   : > { %1413 = shalt.err (!%p1410_p9)
}
 0x484   : > { %s1414_s26 = scalar_lea.hbm %s1918_s23, 128  ;;  %s1418_s14 = scalar_lea.hbm %s1972_s7, 256 }
 0x485   : > { %p1415_p0 = scmp.ne.s32.totalorder %s1918_s23, %s1414_s26  ;;  %p1419_p6 = scmp.lt.u32.totalorder %s1918_s23, %s1972_s7 }
 0x486   : > { %p1420_p4 = scmp.lt.u32.totalorder %s1418_s14, %s1414_s26  ;;  %p1422_p3 = scmp.lt.u32.totalorder %s1414_s26, %s1918_s23 }
 0x487   : > { %p1416_p10 = pnand %p1415_p0, %p2018_p11 }
 0x488   : > { %p1421_p5 = por %p1420_p4, %p1419_p6 }
 0x489   : > { %p1417_p1 = pneg %p1416_p10 }
 0x48a   : > { %p1423_p2 = por %p1422_p3, %p1421_p5 }
 0x48c   : > { %p1424_p7 = pnand %p1423_p2, %p1417_p1 }
 0x48e   : > { %1427 = shalt.err (!%p1424_p7)
}
 0x48f   : > { %1168 = dma.vmem_to_hbm [thread:$0]  (%p2018_p11), %s1911_s19, 128, %s1918_s23, %s705_s30  }
 0x490 PF: > { %s2019_s16 = sld [smem:[#allocation24_spill]]  ;;  %s2020_s20 = sld [smem:[#allocation21_spill]] }
 0x491   : > { %s745_s4 = sand.u32 1, %s1474_s28  }
 0x492   : > { %s746_s15 = scalar_lea.sflag [#allocation6], %s745_s4 }
 0x496   : > { %p2021_p8 = scmp.ne.s32.totalorder %s2019_s16, 0  ;;  %p2022_p13 = scmp.ge.s32.totalorder %s2020_s20, 2 }
 0x498   : > { %p1186_p12 = pnand %p2022_p13, %p2021_p8 }
 0x49a   : > { %1465 = dma.done.wait (!%p1186_p12), %s746_s15, 128  }
 0x49b   : > { %1467 = vsyncadd (!%p1186_p12), %s746_s15, 4294967168  ;;  %s755_s12 = scalar_lea.sflag [#allocation14], %s745_s4 }
 0x49c   : > { %1469 = dma.done.wait (!%p1186_p12), %s755_s12, 128  }
 0x49d   : > { %1471 = vsyncadd (!%p1186_p12), %s755_s12, 4294967168  ;;  %s33_s1 = sadd.s32 1, %s2020_s20   ;;  %s2023_s22 = sld [smem:[#allocation20_spill]] }
 0x49e   : > { %p30_p9 = scmp.ge.s32.totalorder %s33_s1, 4   ;;  %s2024_s30 = sld [smem:[#allocation23_spill]] }
 0x49f   : > { %s2025_s3 = sld [smem:[#allocation22_spill]]  ;;  %s2026_s28 = smov %s1478_s29 }
 0x4a0   : > { %s2028_s0 = smov %s1490_s8  ;;  %32 = sbr.rel (!%p30_p9) target bundleno = 16 (0x10), region = 135 }
 0x4a3   : > { %s2027_s29 = smov %s2023_s22 }
 0x4a5   : > { %s2029_s8 = smov %s2025_s3 }
 0x4a7   :  { %760 = vsyncpa [#allocation5], 1 }
 0x4a8   :  { %762 = vsyncpa [#allocation5 + $0x1], 1 }
 0x4a9   :  { %763 = vsyncpa [#allocation8], 1 }
 0x4aa   :  { %765 = vsyncpa [#allocation8 + $0x1], 1 }
 0x4ab   :  { %766 = vsyncpa [#allocation11], 1 }
 0x4ac   :  { %768 = vsyncpa [#allocation11 + $0x1], 1 }
 0x4ad   :  { %769 = vsyncpa [#allocation6], 1 }
 0x4ae   :  { %771 = vsyncpa [#allocation6 + $0x1], 1 }
 0x4af   :  { %772 = vsyncpa [#allocation14], 1 }
 0x4b0   :  { %774 = vsyncpa [#allocation14 + $0x1], 1 }

</bundles_post_ra>
